<compile_context>
chip_gen: v7x
topology: tpu7x:2x2x1
jax: 0.10.0
libtpu: 0.0.40
codegen_flags: <defaults>
</compile_context>

<pallas_src>
import functools
import math

import jax
import jax.numpy as jnp
from jax.experimental import pallas as pl
from jax.experimental.pallas import tpu as pltpu


# --------------------------------------------------------------------------- #
# Model config (synthetic BERT)
# --------------------------------------------------------------------------- #
VOCAB = 30
MAX_POS = 16
N_TYPES = 2
BERT_DIM = 32
N_HEADS = 2
HEAD_DIM = BERT_DIM // N_HEADS
FFN_DIM = 64
POLARITIES = 3
P_PAD = 128            # lane-dense classifier output slab (sliced to POLARITIES outside)
LN_EPS = 1e-12


# --------------------------------------------------------------------------- #
# In-kernel helpers
# --------------------------------------------------------------------------- #
def _layernorm(h, gamma, beta, eps):
    mu = jnp.mean(h, axis=-1, keepdims=True)
    var = jnp.mean((h - mu) ** 2, axis=-1, keepdims=True)
    return (h - mu) * jax.lax.rsqrt(var + eps) * gamma + beta


def _gelu(x):
    # TODO(synk): HF/PyTorch BERT default is erf-based GELU; tanh approximation drifts slightly.
    return 0.5 * x * (1.0 + jnp.tanh(0.7978845608028654 * (x + 0.044715 * x * x * x)))


# --------------------------------------------------------------------------- #
# Fused Pallas kernel: encoder layer + pooler + dropout(identity) + dense head
# --------------------------------------------------------------------------- #
def _bert_spc_fused_kernel(
    emb_ref,                                      # (B*S, D) summed embeddings
    ln_emb_g_ref, ln_emb_b_ref,                   # (1, D)
    wq_ref, bq_ref, wk_ref, bk_ref, wv_ref, bv_ref,
    wo_ref, bo_ref,
    ln1_g_ref, ln1_b_ref,
    w_ff1_ref, b_ff1_ref, w_ff2_ref, b_ff2_ref,
    ln2_g_ref, ln2_b_ref,
    w_pool_ref, b_pool_ref,
    w_dense_ref, b_dense_ref,                     # padded to (D, P_PAD) / (1, P_PAD)
    logits_ref,                                   # out: (B, P_PAD)
    *, B, S, H, Dh, eps,
):
    f32 = jnp.float32

    # ---- embedding layernorm (no zeros-residual; fused) -------------------- #
    x = _layernorm(emb_ref[...].astype(f32), ln_emb_g_ref[...], ln_emb_b_ref[...], eps)

    # ---- self-attention ----------------------------------------------------- #
    q = jnp.dot(x, wq_ref[...], preferred_element_type=f32) + bq_ref[...]
    k = jnp.dot(x, wk_ref[...], preferred_element_type=f32) + bk_ref[...]
    v = jnp.dot(x, wv_ref[...], preferred_element_type=f32) + bv_ref[...]

    scale = 1.0 / math.sqrt(Dh)
    # Heads are contiguous Dh-wide lane groups; batch items are contiguous
    # S-row sublane groups of the (B*S, D) layout -> static VMEM slices,
    # no XLA transpose / relayout round-trips through HBM.
    # TODO(synk): no padding attention mask (real BERT_SPC masks pad tokens).
    batch_ctx = []
    for b in range(B):
        r0 = b * S
        head_ctx = []
        for h in range(H):
            c0 = h * Dh
            qbh = q[r0:r0 + S, c0:c0 + Dh]
            kbh = k[r0:r0 + S, c0:c0 + Dh]
            vbh = v[r0:r0 + S, c0:c0 + Dh]
            s = jax.lax.dot_general(
                qbh, kbh, (((1,), (1,)), ((), ())), preferred_element_type=f32
            ) * scale
            s = s - jnp.max(s, axis=-1, keepdims=True)
            p = jnp.exp(s)
            p = p / jnp.sum(p, axis=-1, keepdims=True)
            head_ctx.append(jnp.dot(p, vbh, preferred_element_type=f32))
        batch_ctx.append(jnp.concatenate(head_ctx, axis=-1))
    ctx = jnp.concatenate(batch_ctx, axis=0)       # (B*S, D)

    attn_out = jnp.dot(ctx, wo_ref[...], preferred_element_type=f32) + bo_ref[...]
    h1 = _layernorm(x + attn_out, ln1_g_ref[...], ln1_b_ref[...], eps)

    # ---- feed-forward -------------------------------------------------------- #
    ff = _gelu(jnp.dot(h1, w_ff1_ref[...], preferred_element_type=f32) + b_ff1_ref[...])
    ff = jnp.dot(ff, w_ff2_ref[...], preferred_element_type=f32) + b_ff2_ref[...]
    h2 = _layernorm(h1 + ff, ln2_g_ref[...], ln2_b_ref[...], eps)

    # ---- pooler on [CLS] rows + dropout(identity at eval) + dense head ------- #
    cls = jnp.concatenate([h2[b * S:b * S + 1, :] for b in range(B)], axis=0)   # (B, D)
    pooled = jnp.tanh(
        jnp.dot(cls, w_pool_ref[...], preferred_element_type=f32) + b_pool_ref[...]
    )
    # TODO(synk): nn.Dropout in training mode would need a PRNG path; eval mode == identity.
    logits = jnp.dot(pooled, w_dense_ref[...], preferred_element_type=f32) + b_dense_ref[...]
    logits_ref[...] = logits.astype(logits_ref.dtype)


# --------------------------------------------------------------------------- #
# Wrapper
# --------------------------------------------------------------------------- #
def _full_spec(shape):
    nd = len(shape)
    return pl.BlockSpec(shape, lambda i, _nd=nd: (0,) * _nd)


def bert_spc_fused(emb, params, *, B, S):
    D, F = BERT_DIM, FFN_DIM
    # Pad the classifier head so the kernel's output store is a lane-dense
    # (B, 128) slab (unmasked vst); slice the real P columns in the wrapper.
    w_dense_p = jnp.pad(params["w_dense"], ((0, 0), (0, P_PAD - POLARITIES)))
    b_dense_p = jnp.pad(params["b_dense"], ((0, P_PAD - POLARITIES),)).reshape(1, P_PAD)

    args = (
        emb,
        params["ln_emb_g"].reshape(1, D), params["ln_emb_b"].reshape(1, D),
        params["wq"], params["bq"].reshape(1, D),
        params["wk"], params["bk"].reshape(1, D),
        params["wv"], params["bv"].reshape(1, D),
        params["wo"], params["bo"].reshape(1, D),
        params["ln1_g"].reshape(1, D), params["ln1_b"].reshape(1, D),
        params["w_ff1"], params["b_ff1"].reshape(1, F),
        params["w_ff2"], params["b_ff2"].reshape(1, D),
        params["ln2_g"].reshape(1, D), params["ln2_b"].reshape(1, D),
        params["w_pool"], params["b_pool"].reshape(1, D),
        w_dense_p, b_dense_p,
    )
    in_specs = [_full_spec(a.shape) for a in args]

    logits_pad = pl.pallas_call(
        functools.partial(
            _bert_spc_fused_kernel, B=B, S=S, H=N_HEADS, Dh=HEAD_DIM, eps=LN_EPS
        ),
        out_shape=jax.ShapeDtypeStruct((B, P_PAD), jnp.float32),
        grid=(1,),
        in_specs=in_specs,
        out_specs=_full_spec((B, P_PAD)),
        compiler_params=pltpu.CompilerParams(dimension_semantics=("arbitrary",)),
    )(*args)
    return logits_pad[:, :POLARITIES]


# --------------------------------------------------------------------------- #
# Parameters
# --------------------------------------------------------------------------- #
def init_params(key):
    def nrm(k, shape, scale=0.02):
        return scale * jax.random.normal(k, shape, dtype=jnp.float32)

    keys = jax.random.split(key, 16)
    D, F, P = BERT_DIM, FFN_DIM, POLARITIES
    return {
        "word_emb": nrm(keys[0], (VOCAB, D)),
        "pos_emb": nrm(keys[1], (MAX_POS, D)),
        "tok_emb": nrm(keys[2], (N_TYPES, D)),
        "ln_emb_g": jnp.ones((D,), jnp.float32),
        "ln_emb_b": jnp.zeros((D,), jnp.float32),
        "wq": nrm(keys[3], (D, D)), "bq": jnp.zeros((D,), jnp.float32),
        "wk": nrm(keys[4], (D, D)), "bk": jnp.zeros((D,), jnp.float32),
        "wv": nrm(keys[5], (D, D)), "bv": jnp.zeros((D,), jnp.float32),
        "wo": nrm(keys[6], (D, D)), "bo": jnp.zeros((D,), jnp.float32),
        "ln1_g": jnp.ones((D,), jnp.float32), "ln1_b": jnp.zeros((D,), jnp.float32),
        "w_ff1": nrm(keys[7], (D, F)), "b_ff1": jnp.zeros((F,), jnp.float32),
        "w_ff2": nrm(keys[8], (F, D)), "b_ff2": jnp.zeros((D,), jnp.float32),
        "ln2_g": jnp.ones((D,), jnp.float32), "ln2_b": jnp.zeros((D,), jnp.float32),
        "w_pool": nrm(keys[9], (D, D)), "b_pool": jnp.zeros((D,), jnp.float32),
        "w_dense": nrm(keys[10], (D, P)), "b_dense": jnp.zeros((P,), jnp.float32),
    }


# --------------------------------------------------------------------------- #
# Forward: embeddings (gather = plain-JAX glue) + fused Pallas kernel
# --------------------------------------------------------------------------- #
@jax.jit
def bert_spc_forward(params, concat_bert_indices, concat_segments_ids):
    B, S = concat_bert_indices.shape
    assert S <= MAX_POS, "sequence length exceeds positional embedding table"
    D = BERT_DIM

    emb = (
        jnp.take(params["word_emb"], concat_bert_indices, axis=0)
        + jnp.take(params["tok_emb"], concat_segments_ids, axis=0)
        + params["pos_emb"][:S][None, :, :]
    ).reshape(B * S, D)

    return bert_spc_fused(emb, params, B=B, S=S)


# --------------------------------------------------------------------------- #
if __name__ == "__main__":
    key = jax.random.PRNGKey(0)
    pkey, ikey, skey = jax.random.split(key, 3)

    params = init_params(pkey)

    B, S = 2, 8
    concat_bert_indices = jax.random.randint(ikey, (B, S), 0, VOCAB, dtype=jnp.int32)
    concat_segments_ids = jax.random.randint(skey, (B, S), 0, N_TYPES, dtype=jnp.int32)

    logits = bert_spc_forward(params, concat_bert_indices, concat_segments_ids)
    jax.block_until_ready(logits)

    assert logits.shape == (B, POLARITIES)
    assert bool(jnp.all(jnp.isfinite(logits)))
    print("KERNEL_OK")
</pallas_src>

<mosaic_0001>
module attributes {stable_mosaic.version = 11 : i64} {
  func.func @_bert_spc_fused_kernel(%arg0: i32, %arg1: memref<16x32xf32, #tpu.memory_space<vmem>>, %arg2: memref<1x32xf32, #tpu.memory_space<vmem>>, %arg3: memref<1x32xf32, #tpu.memory_space<vmem>>, %arg4: memref<32x32xf32, #tpu.memory_space<vmem>>, %arg5: memref<1x32xf32, #tpu.memory_space<vmem>>, %arg6: memref<32x32xf32, #tpu.memory_space<vmem>>, %arg7: memref<1x32xf32, #tpu.memory_space<vmem>>, %arg8: memref<32x32xf32, #tpu.memory_space<vmem>>, %arg9: memref<1x32xf32, #tpu.memory_space<vmem>>, %arg10: memref<32x32xf32, #tpu.memory_space<vmem>>, %arg11: memref<1x32xf32, #tpu.memory_space<vmem>>, %arg12: memref<1x32xf32, #tpu.memory_space<vmem>>, %arg13: memref<1x32xf32, #tpu.memory_space<vmem>>, %arg14: memref<32x64xf32, #tpu.memory_space<vmem>>, %arg15: memref<1x64xf32, #tpu.memory_space<vmem>>, %arg16: memref<64x32xf32, #tpu.memory_space<vmem>>, %arg17: memref<1x32xf32, #tpu.memory_space<vmem>>, %arg18: memref<1x32xf32, #tpu.memory_space<vmem>>, %arg19: memref<1x32xf32, #tpu.memory_space<vmem>>, %arg20: memref<32x32xf32, #tpu.memory_space<vmem>>, %arg21: memref<1x32xf32, #tpu.memory_space<vmem>>, %arg22: memref<32x128xf32, #tpu.memory_space<vmem>>, %arg23: memref<1x128xf32, #tpu.memory_space<vmem>>, %arg24: memref<2x128xf32, #tpu.memory_space<vmem>>) attributes {dimension_semantics = [#tpu.dimension_semantics<arbitrary>], iteration_bounds = array<i64: 1>, scalar_prefetch = 0 : i64, scratch_operands = 0 : i64, tpu.core_type = #tpu.core_type<tc>, window_params = [{pipeline_mode = #tpu.pipeline_mode<synchronous>, transform_indices = @transform_0, window_bounds = array<i64: 16, 32>}, {pipeline_mode = #tpu.pipeline_mode<synchronous>, transform_indices = @transform_1, window_bounds = array<i64: 1, 32>}, {pipeline_mode = #tpu.pipeline_mode<synchronous>, transform_indices = @transform_2, window_bounds = array<i64: 1, 32>}, {pipeline_mode = #tpu.pipeline_mode<synchronous>, transform_indices = @transform_3, window_bounds = array<i64: 32, 32>}, {pipeline_mode = #tpu.pipeline_mode<synchronous>, transform_indices = @transform_4, window_bounds = array<i64: 1, 32>}, {pipeline_mode = #tpu.pipeline_mode<synchronous>, transform_indices = @transform_5, window_bounds = array<i64: 32, 32>}, {pipeline_mode = #tpu.pipeline_mode<synchronous>, transform_indices = @transform_6, window_bounds = array<i64: 1, 32>}, {pipeline_mode = #tpu.pipeline_mode<synchronous>, transform_indices = @transform_7, window_bounds = array<i64: 32, 32>}, {pipeline_mode = #tpu.pipeline_mode<synchronous>, transform_indices = @transform_8, window_bounds = array<i64: 1, 32>}, {pipeline_mode = #tpu.pipeline_mode<synchronous>, transform_indices = @transform_9, window_bounds = array<i64: 32, 32>}, {pipeline_mode = #tpu.pipeline_mode<synchronous>, transform_indices = @transform_10, window_bounds = array<i64: 1, 32>}, {pipeline_mode = #tpu.pipeline_mode<synchronous>, transform_indices = @transform_11, window_bounds = array<i64: 1, 32>}, {pipeline_mode = #tpu.pipeline_mode<synchronous>, transform_indices = @transform_12, window_bounds = array<i64: 1, 32>}, {pipeline_mode = #tpu.pipeline_mode<synchronous>, transform_indices = @transform_13, window_bounds = array<i64: 32, 64>}, {pipeline_mode = #tpu.pipeline_mode<synchronous>, transform_indices = @transform_14, window_bounds = array<i64: 1, 64>}, {pipeline_mode = #tpu.pipeline_mode<synchronous>, transform_indices = @transform_15, window_bounds = array<i64: 64, 32>}, {pipeline_mode = #tpu.pipeline_mode<synchronous>, transform_indices = @transform_16, window_bounds = array<i64: 1, 32>}, {pipeline_mode = #tpu.pipeline_mode<synchronous>, transform_indices = @transform_17, window_bounds = array<i64: 1, 32>}, {pipeline_mode = #tpu.pipeline_mode<synchronous>, transform_indices = @transform_18, window_bounds = array<i64: 1, 32>}, {pipeline_mode = #tpu.pipeline_mode<synchronous>, transform_indices = @transform_19, window_bounds = array<i64: 32, 32>}, {pipeline_mode = #tpu.pipeline_mode<synchronous>, transform_indices = @transform_20, window_bounds = array<i64: 1, 32>}, {pipeline_mode = #tpu.pipeline_mode<synchronous>, transform_indices = @transform_21, window_bounds = array<i64: 32, 128>}, {pipeline_mode = #tpu.pipeline_mode<synchronous>, transform_indices = @transform_22, window_bounds = array<i64: 1, 128>}, {pipeline_mode = #tpu.pipeline_mode<synchronous>, transform_indices = @transform_23, window_bounds = array<i64: 2, 128>}]} {
    %c0 = arith.constant 0 : index
    %c0_0 = arith.constant 0 : index
    %0 = vector.load %arg1[%c0, %c0_0] : memref<16x32xf32, #tpu.memory_space<vmem>>, vector<16x32xf32>
    %c0_1 = arith.constant 0 : index
    %c0_2 = arith.constant 0 : index
    %1 = vector.load %arg2[%c0_1, %c0_2] : memref<1x32xf32, #tpu.memory_space<vmem>>, vector<1x32xf32>
    %c0_3 = arith.constant 0 : index
    %c0_4 = arith.constant 0 : index
    %2 = vector.load %arg3[%c0_3, %c0_4] : memref<1x32xf32, #tpu.memory_space<vmem>>, vector<1x32xf32>
    %cst = arith.constant dense<0.000000e+00> : vector<16xf32>
    %3 = vector.multi_reduction <add>, %0, %cst [1] : vector<16x32xf32> to vector<16xf32>
    %4 = vector.shape_cast %3 : vector<16xf32> to vector<16x1xf32>
    %cst_5 = arith.constant 3.200000e+01 : f32
    %5 = vector.broadcast %cst_5 : f32 to vector<16x1xf32>
    %6 = arith.divf %4, %5 : vector<16x1xf32>
    %7 = vector.broadcast %6 : vector<16x1xf32> to vector<16x32xf32>
    %8 = arith.subf %0, %7 : vector<16x32xf32>
    %9 = arith.mulf %8, %8 : vector<16x32xf32>
    %cst_6 = arith.constant dense<0.000000e+00> : vector<16xf32>
    %10 = vector.multi_reduction <add>, %9, %cst_6 [1] : vector<16x32xf32> to vector<16xf32>
    %11 = vector.shape_cast %10 : vector<16xf32> to vector<16x1xf32>
    %cst_7 = arith.constant 3.200000e+01 : f32
    %12 = vector.broadcast %cst_7 : f32 to vector<16x1xf32>
    %13 = arith.divf %11, %12 : vector<16x1xf32>
    %14 = vector.broadcast %6 : vector<16x1xf32> to vector<16x32xf32>
    %15 = arith.subf %0, %14 : vector<16x32xf32>
    %cst_8 = arith.constant 9.99999996E-13 : f32
    %16 = vector.broadcast %cst_8 : f32 to vector<16x1xf32>
    %17 = arith.addf %13, %16 : vector<16x1xf32>
    %18 = math.rsqrt %17 : vector<16x1xf32>
    %19 = vector.broadcast %18 : vector<16x1xf32> to vector<16x32xf32>
    %20 = arith.mulf %15, %19 : vector<16x32xf32>
    %21 = vector.broadcast %1 : vector<1x32xf32> to vector<16x32xf32>
    %22 = arith.mulf %20, %21 : vector<16x32xf32>
    %23 = vector.broadcast %2 : vector<1x32xf32> to vector<16x32xf32>
    %24 = arith.addf %22, %23 : vector<16x32xf32>
    %c0_9 = arith.constant 0 : index
    %c0_10 = arith.constant 0 : index
    %25 = vector.load %arg4[%c0_9, %c0_10] : memref<32x32xf32, #tpu.memory_space<vmem>>, vector<32x32xf32>
    %cst_11 = arith.constant dense<0.000000e+00> : vector<16x32xf32>
    %26 = tpu.matmul %24, %25, %cst_11 {dimension_numbers = #tpu.dot_dimension_numbers<[1], [0], [0], [1], [0, 0, 1, 1], [], []>} : vector<16x32xf32>, vector<32x32xf32>, vector<16x32xf32> -> vector<16x32xf32>
    %c0_12 = arith.constant 0 : index
    %c0_13 = arith.constant 0 : index
    %27 = vector.load %arg5[%c0_12, %c0_13] : memref<1x32xf32, #tpu.memory_space<vmem>>, vector<1x32xf32>
    %28 = vector.broadcast %27 : vector<1x32xf32> to vector<16x32xf32>
    %29 = arith.addf %26, %28 : vector<16x32xf32>
    %c0_14 = arith.constant 0 : index
    %c0_15 = arith.constant 0 : index
    %30 = vector.load %arg6[%c0_14, %c0_15] : memref<32x32xf32, #tpu.memory_space<vmem>>, vector<32x32xf32>
    %cst_16 = arith.constant dense<0.000000e+00> : vector<16x32xf32>
    %31 = tpu.matmul %24, %30, %cst_16 {dimension_numbers = #tpu.dot_dimension_numbers<[1], [0], [0], [1], [0, 0, 1, 1], [], []>} : vector<16x32xf32>, vector<32x32xf32>, vector<16x32xf32> -> vector<16x32xf32>
    %c0_17 = arith.constant 0 : index
    %c0_18 = arith.constant 0 : index
    %32 = vector.load %arg7[%c0_17, %c0_18] : memref<1x32xf32, #tpu.memory_space<vmem>>, vector<1x32xf32>
    %33 = vector.broadcast %32 : vector<1x32xf32> to vector<16x32xf32>
    %34 = arith.addf %31, %33 : vector<16x32xf32>
    %c0_19 = arith.constant 0 : index
    %c0_20 = arith.constant 0 : index
    %35 = vector.load %arg8[%c0_19, %c0_20] : memref<32x32xf32, #tpu.memory_space<vmem>>, vector<32x32xf32>
    %cst_21 = arith.constant dense<0.000000e+00> : vector<16x32xf32>
    %36 = tpu.matmul %24, %35, %cst_21 {dimension_numbers = #tpu.dot_dimension_numbers<[1], [0], [0], [1], [0, 0, 1, 1], [], []>} : vector<16x32xf32>, vector<32x32xf32>, vector<16x32xf32> -> vector<16x32xf32>
    %c0_22 = arith.constant 0 : index
    %c0_23 = arith.constant 0 : index
    %37 = vector.load %arg9[%c0_22, %c0_23] : memref<1x32xf32, #tpu.memory_space<vmem>>, vector<1x32xf32>
    %38 = vector.broadcast %37 : vector<1x32xf32> to vector<16x32xf32>
    %39 = arith.addf %36, %38 : vector<16x32xf32>
    %40 = vector.extract_strided_slice %29 {offsets = [0, 0], sizes = [8, 16], strides = [1, 1]} : vector<16x32xf32> to vector<8x16xf32>
    %41 = vector.extract_strided_slice %34 {offsets = [0, 0], sizes = [8, 16], strides = [1, 1]} : vector<16x32xf32> to vector<8x16xf32>
    %42 = vector.extract_strided_slice %39 {offsets = [0, 0], sizes = [8, 16], strides = [1, 1]} : vector<16x32xf32> to vector<8x16xf32>
    %cst_24 = arith.constant dense<0.000000e+00> : vector<8x8xf32>
    %43 = tpu.matmul %40, %41, %cst_24 {dimension_numbers = #tpu.dot_dimension_numbers<[1], [1], [0], [0], [0, 0, 1, 0], [], []>} : vector<8x16xf32>, vector<8x16xf32>, vector<8x8xf32> -> vector<8x8xf32>
    %cst_25 = arith.constant 2.500000e-01 : f32
    %44 = vector.broadcast %cst_25 : f32 to vector<8x8xf32>
    %45 = arith.mulf %43, %44 : vector<8x8xf32>
    %cst_26 = arith.constant dense<0xFF800000> : vector<8xf32>
    %46 = vector.multi_reduction <maximumf>, %45, %cst_26 [1] : vector<8x8xf32> to vector<8xf32>
    %47 = vector.shape_cast %46 : vector<8xf32> to vector<8x1xf32>
    %48 = vector.broadcast %47 : vector<8x1xf32> to vector<8x8xf32>
    %49 = arith.subf %45, %48 : vector<8x8xf32>
    %50 = math.exp %49 : vector<8x8xf32>
    %cst_27 = arith.constant dense<0.000000e+00> : vector<8xf32>
    %51 = vector.multi_reduction <add>, %50, %cst_27 [1] : vector<8x8xf32> to vector<8xf32>
    %52 = vector.shape_cast %51 : vector<8xf32> to vector<8x1xf32>
    %53 = vector.broadcast %52 : vector<8x1xf32> to vector<8x8xf32>
    %54 = arith.divf %50, %53 : vector<8x8xf32>
    %cst_28 = arith.constant dense<0.000000e+00> : vector<8x16xf32>
    %55 = tpu.matmul %54, %42, %cst_28 {dimension_numbers = #tpu.dot_dimension_numbers<[1], [0], [0], [1], [0, 0, 1, 1], [], []>} : vector<8x8xf32>, vector<8x16xf32>, vector<8x16xf32> -> vector<8x16xf32>
    %56 = vector.extract_strided_slice %29 {offsets = [0, 16], sizes = [8, 16], strides = [1, 1]} : vector<16x32xf32> to vector<8x16xf32>
    %57 = vector.extract_strided_slice %34 {offsets = [0, 16], sizes = [8, 16], strides = [1, 1]} : vector<16x32xf32> to vector<8x16xf32>
    %58 = vector.extract_strided_slice %39 {offsets = [0, 16], sizes = [8, 16], strides = [1, 1]} : vector<16x32xf32> to vector<8x16xf32>
    %cst_29 = arith.constant dense<0.000000e+00> : vector<8x8xf32>
    %59 = tpu.matmul %56, %57, %cst_29 {dimension_numbers = #tpu.dot_dimension_numbers<[1], [1], [0], [0], [0, 0, 1, 0], [], []>} : vector<8x16xf32>, vector<8x16xf32>, vector<8x8xf32> -> vector<8x8xf32>
    %cst_30 = arith.constant 2.500000e-01 : f32
    %60 = vector.broadcast %cst_30 : f32 to vector<8x8xf32>
    %61 = arith.mulf %59, %60 : vector<8x8xf32>
    %cst_31 = arith.constant dense<0xFF800000> : vector<8xf32>
    %62 = vector.multi_reduction <maximumf>, %61, %cst_31 [1] : vector<8x8xf32> to vector<8xf32>
    %63 = vector.shape_cast %62 : vector<8xf32> to vector<8x1xf32>
    %64 = vector.broadcast %63 : vector<8x1xf32> to vector<8x8xf32>
    %65 = arith.subf %61, %64 : vector<8x8xf32>
    %66 = math.exp %65 : vector<8x8xf32>
    %cst_32 = arith.constant dense<0.000000e+00> : vector<8xf32>
    %67 = vector.multi_reduction <add>, %66, %cst_32 [1] : vector<8x8xf32> to vector<8xf32>
    %68 = vector.shape_cast %67 : vector<8xf32> to vector<8x1xf32>
    %69 = vector.broadcast %68 : vector<8x1xf32> to vector<8x8xf32>
    %70 = arith.divf %66, %69 : vector<8x8xf32>
    %cst_33 = arith.constant dense<0.000000e+00> : vector<8x16xf32>
    %71 = tpu.matmul %70, %58, %cst_33 {dimension_numbers = #tpu.dot_dimension_numbers<[1], [0], [0], [1], [0, 0, 1, 1], [], []>} : vector<8x8xf32>, vector<8x16xf32>, vector<8x16xf32> -> vector<8x16xf32>
    %72 = tpu.concatenate %55, %71 in 1 : vector<8x16xf32>, vector<8x16xf32> -> vector<8x32xf32>
    %73 = vector.extract_strided_slice %29 {offsets = [8, 0], sizes = [8, 16], strides = [1, 1]} : vector<16x32xf32> to vector<8x16xf32>
    %74 = vector.extract_strided_slice %34 {offsets = [8, 0], sizes = [8, 16], strides = [1, 1]} : vector<16x32xf32> to vector<8x16xf32>
    %75 = vector.extract_strided_slice %39 {offsets = [8, 0], sizes = [8, 16], strides = [1, 1]} : vector<16x32xf32> to vector<8x16xf32>
    %cst_34 = arith.constant dense<0.000000e+00> : vector<8x8xf32>
    %76 = tpu.matmul %73, %74, %cst_34 {dimension_numbers = #tpu.dot_dimension_numbers<[1], [1], [0], [0], [0, 0, 1, 0], [], []>} : vector<8x16xf32>, vector<8x16xf32>, vector<8x8xf32> -> vector<8x8xf32>
    %cst_35 = arith.constant 2.500000e-01 : f32
    %77 = vector.broadcast %cst_35 : f32 to vector<8x8xf32>
    %78 = arith.mulf %76, %77 : vector<8x8xf32>
    %cst_36 = arith.constant dense<0xFF800000> : vector<8xf32>
    %79 = vector.multi_reduction <maximumf>, %78, %cst_36 [1] : vector<8x8xf32> to vector<8xf32>
    %80 = vector.shape_cast %79 : vector<8xf32> to vector<8x1xf32>
    %81 = vector.broadcast %80 : vector<8x1xf32> to vector<8x8xf32>
    %82 = arith.subf %78, %81 : vector<8x8xf32>
    %83 = math.exp %82 : vector<8x8xf32>
    %cst_37 = arith.constant dense<0.000000e+00> : vector<8xf32>
    %84 = vector.multi_reduction <add>, %83, %cst_37 [1] : vector<8x8xf32> to vector<8xf32>
    %85 = vector.shape_cast %84 : vector<8xf32> to vector<8x1xf32>
    %86 = vector.broadcast %85 : vector<8x1xf32> to vector<8x8xf32>
    %87 = arith.divf %83, %86 : vector<8x8xf32>
    %cst_38 = arith.constant dense<0.000000e+00> : vector<8x16xf32>
    %88 = tpu.matmul %87, %75, %cst_38 {dimension_numbers = #tpu.dot_dimension_numbers<[1], [0], [0], [1], [0, 0, 1, 1], [], []>} : vector<8x8xf32>, vector<8x16xf32>, vector<8x16xf32> -> vector<8x16xf32>
    %89 = vector.extract_strided_slice %29 {offsets = [8, 16], sizes = [8, 16], strides = [1, 1]} : vector<16x32xf32> to vector<8x16xf32>
    %90 = vector.extract_strided_slice %34 {offsets = [8, 16], sizes = [8, 16], strides = [1, 1]} : vector<16x32xf32> to vector<8x16xf32>
    %91 = vector.extract_strided_slice %39 {offsets = [8, 16], sizes = [8, 16], strides = [1, 1]} : vector<16x32xf32> to vector<8x16xf32>
    %cst_39 = arith.constant dense<0.000000e+00> : vector<8x8xf32>
    %92 = tpu.matmul %89, %90, %cst_39 {dimension_numbers = #tpu.dot_dimension_numbers<[1], [1], [0], [0], [0, 0, 1, 0], [], []>} : vector<8x16xf32>, vector<8x16xf32>, vector<8x8xf32> -> vector<8x8xf32>
    %cst_40 = arith.constant 2.500000e-01 : f32
    %93 = vector.broadcast %cst_40 : f32 to vector<8x8xf32>
    %94 = arith.mulf %92, %93 : vector<8x8xf32>
    %cst_41 = arith.constant dense<0xFF800000> : vector<8xf32>
    %95 = vector.multi_reduction <maximumf>, %94, %cst_41 [1] : vector<8x8xf32> to vector<8xf32>
    %96 = vector.shape_cast %95 : vector<8xf32> to vector<8x1xf32>
    %97 = vector.broadcast %96 : vector<8x1xf32> to vector<8x8xf32>
    %98 = arith.subf %94, %97 : vector<8x8xf32>
    %99 = math.exp %98 : vector<8x8xf32>
    %cst_42 = arith.constant dense<0.000000e+00> : vector<8xf32>
    %100 = vector.multi_reduction <add>, %99, %cst_42 [1] : vector<8x8xf32> to vector<8xf32>
    %101 = vector.shape_cast %100 : vector<8xf32> to vector<8x1xf32>
    %102 = vector.broadcast %101 : vector<8x1xf32> to vector<8x8xf32>
    %103 = arith.divf %99, %102 : vector<8x8xf32>
    %cst_43 = arith.constant dense<0.000000e+00> : vector<8x16xf32>
    %104 = tpu.matmul %103, %91, %cst_43 {dimension_numbers = #tpu.dot_dimension_numbers<[1], [0], [0], [1], [0, 0, 1, 1], [], []>} : vector<8x8xf32>, vector<8x16xf32>, vector<8x16xf32> -> vector<8x16xf32>
    %105 = tpu.concatenate %88, %104 in 1 : vector<8x16xf32>, vector<8x16xf32> -> vector<8x32xf32>
    %106 = tpu.concatenate %72, %105 in 0 : vector<8x32xf32>, vector<8x32xf32> -> vector<16x32xf32>
    %c0_44 = arith.constant 0 : index
    %c0_45 = arith.constant 0 : index
    %107 = vector.load %arg10[%c0_44, %c0_45] : memref<32x32xf32, #tpu.memory_space<vmem>>, vector<32x32xf32>
    %cst_46 = arith.constant dense<0.000000e+00> : vector<16x32xf32>
    %108 = tpu.matmul %106, %107, %cst_46 {dimension_numbers = #tpu.dot_dimension_numbers<[1], [0], [0], [1], [0, 0, 1, 1], [], []>} : vector<16x32xf32>, vector<32x32xf32>, vector<16x32xf32> -> vector<16x32xf32>
    %c0_47 = arith.constant 0 : index
    %c0_48 = arith.constant 0 : index
    %109 = vector.load %arg11[%c0_47, %c0_48] : memref<1x32xf32, #tpu.memory_space<vmem>>, vector<1x32xf32>
    %110 = vector.broadcast %109 : vector<1x32xf32> to vector<16x32xf32>
    %111 = arith.addf %108, %110 : vector<16x32xf32>
    %112 = arith.addf %24, %111 : vector<16x32xf32>
    %c0_49 = arith.constant 0 : index
    %c0_50 = arith.constant 0 : index
    %113 = vector.load %arg12[%c0_49, %c0_50] : memref<1x32xf32, #tpu.memory_space<vmem>>, vector<1x32xf32>
    %c0_51 = arith.constant 0 : index
    %c0_52 = arith.constant 0 : index
    %114 = vector.load %arg13[%c0_51, %c0_52] : memref<1x32xf32, #tpu.memory_space<vmem>>, vector<1x32xf32>
    %cst_53 = arith.constant dense<0.000000e+00> : vector<16xf32>
    %115 = vector.multi_reduction <add>, %112, %cst_53 [1] : vector<16x32xf32> to vector<16xf32>
    %116 = vector.shape_cast %115 : vector<16xf32> to vector<16x1xf32>
    %cst_54 = arith.constant 3.200000e+01 : f32
    %117 = vector.broadcast %cst_54 : f32 to vector<16x1xf32>
    %118 = arith.divf %116, %117 : vector<16x1xf32>
    %119 = vector.broadcast %118 : vector<16x1xf32> to vector<16x32xf32>
    %120 = arith.subf %112, %119 : vector<16x32xf32>
    %121 = arith.mulf %120, %120 : vector<16x32xf32>
    %cst_55 = arith.constant dense<0.000000e+00> : vector<16xf32>
    %122 = vector.multi_reduction <add>, %121, %cst_55 [1] : vector<16x32xf32> to vector<16xf32>
    %123 = vector.shape_cast %122 : vector<16xf32> to vector<16x1xf32>
    %cst_56 = arith.constant 3.200000e+01 : f32
    %124 = vector.broadcast %cst_56 : f32 to vector<16x1xf32>
    %125 = arith.divf %123, %124 : vector<16x1xf32>
    %126 = vector.broadcast %118 : vector<16x1xf32> to vector<16x32xf32>
    %127 = arith.subf %112, %126 : vector<16x32xf32>
    %cst_57 = arith.constant 9.99999996E-13 : f32
    %128 = vector.broadcast %cst_57 : f32 to vector<16x1xf32>
    %129 = arith.addf %125, %128 : vector<16x1xf32>
    %130 = math.rsqrt %129 : vector<16x1xf32>
    %131 = vector.broadcast %130 : vector<16x1xf32> to vector<16x32xf32>
    %132 = arith.mulf %127, %131 : vector<16x32xf32>
    %133 = vector.broadcast %113 : vector<1x32xf32> to vector<16x32xf32>
    %134 = arith.mulf %132, %133 : vector<16x32xf32>
    %135 = vector.broadcast %114 : vector<1x32xf32> to vector<16x32xf32>
    %136 = arith.addf %134, %135 : vector<16x32xf32>
    %c0_58 = arith.constant 0 : index
    %c0_59 = arith.constant 0 : index
    %137 = vector.load %arg14[%c0_58, %c0_59] : memref<32x64xf32, #tpu.memory_space<vmem>>, vector<32x64xf32>
    %cst_60 = arith.constant dense<0.000000e+00> : vector<16x64xf32>
    %138 = tpu.matmul %136, %137, %cst_60 {dimension_numbers = #tpu.dot_dimension_numbers<[1], [0], [0], [1], [0, 0, 1, 1], [], []>} : vector<16x32xf32>, vector<32x64xf32>, vector<16x64xf32> -> vector<16x64xf32>
    %c0_61 = arith.constant 0 : index
    %c0_62 = arith.constant 0 : index
    %139 = vector.load %arg15[%c0_61, %c0_62] : memref<1x64xf32, #tpu.memory_space<vmem>>, vector<1x64xf32>
    %140 = vector.broadcast %139 : vector<1x64xf32> to vector<16x64xf32>
    %141 = arith.addf %138, %140 : vector<16x64xf32>
    %cst_63 = arith.constant 5.000000e-01 : f32
    %142 = vector.broadcast %cst_63 : f32 to vector<16x64xf32>
    %143 = arith.mulf %142, %141 : vector<16x64xf32>
    %cst_64 = arith.constant 4.471500e-02 : f32
    %144 = vector.broadcast %cst_64 : f32 to vector<16x64xf32>
    %145 = arith.mulf %144, %141 : vector<16x64xf32>
    %146 = arith.mulf %145, %141 : vector<16x64xf32>
    %147 = arith.mulf %146, %141 : vector<16x64xf32>
    %148 = arith.addf %141, %147 : vector<16x64xf32>
    %cst_65 = arith.constant 0.797884583 : f32
    %149 = vector.broadcast %cst_65 : f32 to vector<16x64xf32>
    %150 = arith.mulf %149, %148 : vector<16x64xf32>
    %151 = math.tanh %150 : vector<16x64xf32>
    %cst_66 = arith.constant 1.000000e+00 : f32
    %152 = vector.broadcast %cst_66 : f32 to vector<16x64xf32>
    %153 = arith.addf %152, %151 : vector<16x64xf32>
    %154 = arith.mulf %143, %153 : vector<16x64xf32>
    %c0_67 = arith.constant 0 : index
    %c0_68 = arith.constant 0 : index
    %155 = vector.load %arg16[%c0_67, %c0_68] : memref<64x32xf32, #tpu.memory_space<vmem>>, vector<64x32xf32>
    %cst_69 = arith.constant dense<0.000000e+00> : vector<16x32xf32>
    %156 = tpu.matmul %154, %155, %cst_69 {dimension_numbers = #tpu.dot_dimension_numbers<[1], [0], [0], [1], [0, 0, 1, 1], [], []>} : vector<16x64xf32>, vector<64x32xf32>, vector<16x32xf32> -> vector<16x32xf32>
    %c0_70 = arith.constant 0 : index
    %c0_71 = arith.constant 0 : index
    %157 = vector.load %arg17[%c0_70, %c0_71] : memref<1x32xf32, #tpu.memory_space<vmem>>, vector<1x32xf32>
    %158 = vector.broadcast %157 : vector<1x32xf32> to vector<16x32xf32>
    %159 = arith.addf %156, %158 : vector<16x32xf32>
    %160 = arith.addf %136, %159 : vector<16x32xf32>
    %c0_72 = arith.constant 0 : index
    %c0_73 = arith.constant 0 : index
    %161 = vector.load %arg18[%c0_72, %c0_73] : memref<1x32xf32, #tpu.memory_space<vmem>>, vector<1x32xf32>
    %c0_74 = arith.constant 0 : index
    %c0_75 = arith.constant 0 : index
    %162 = vector.load %arg19[%c0_74, %c0_75] : memref<1x32xf32, #tpu.memory_space<vmem>>, vector<1x32xf32>
    %cst_76 = arith.constant dense<0.000000e+00> : vector<16xf32>
    %163 = vector.multi_reduction <add>, %160, %cst_76 [1] : vector<16x32xf32> to vector<16xf32>
    %164 = vector.shape_cast %163 : vector<16xf32> to vector<16x1xf32>
    %cst_77 = arith.constant 3.200000e+01 : f32
    %165 = vector.broadcast %cst_77 : f32 to vector<16x1xf32>
    %166 = arith.divf %164, %165 : vector<16x1xf32>
    %167 = vector.broadcast %166 : vector<16x1xf32> to vector<16x32xf32>
    %168 = arith.subf %160, %167 : vector<16x32xf32>
    %169 = arith.mulf %168, %168 : vector<16x32xf32>
    %cst_78 = arith.constant dense<0.000000e+00> : vector<16xf32>
    %170 = vector.multi_reduction <add>, %169, %cst_78 [1] : vector<16x32xf32> to vector<16xf32>
    %171 = vector.shape_cast %170 : vector<16xf32> to vector<16x1xf32>
    %cst_79 = arith.constant 3.200000e+01 : f32
    %172 = vector.broadcast %cst_79 : f32 to vector<16x1xf32>
    %173 = arith.divf %171, %172 : vector<16x1xf32>
    %174 = vector.broadcast %166 : vector<16x1xf32> to vector<16x32xf32>
    %175 = arith.subf %160, %174 : vector<16x32xf32>
    %cst_80 = arith.constant 9.99999996E-13 : f32
    %176 = vector.broadcast %cst_80 : f32 to vector<16x1xf32>
    %177 = arith.addf %173, %176 : vector<16x1xf32>
    %178 = math.rsqrt %177 : vector<16x1xf32>
    %179 = vector.broadcast %178 : vector<16x1xf32> to vector<16x32xf32>
    %180 = arith.mulf %175, %179 : vector<16x32xf32>
    %181 = vector.broadcast %161 : vector<1x32xf32> to vector<16x32xf32>
    %182 = arith.mulf %180, %181 : vector<16x32xf32>
    %183 = vector.broadcast %162 : vector<1x32xf32> to vector<16x32xf32>
    %184 = arith.addf %182, %183 : vector<16x32xf32>
    %185 = vector.extract_strided_slice %184 {offsets = [0, 0], sizes = [1, 32], strides = [1, 1]} : vector<16x32xf32> to vector<1x32xf32>
    %186 = vector.extract_strided_slice %184 {offsets = [8, 0], sizes = [1, 32], strides = [1, 1]} : vector<16x32xf32> to vector<1x32xf32>
    %187 = tpu.concatenate %185, %186 in 0 : vector<1x32xf32>, vector<1x32xf32> -> vector<2x32xf32>
    %c0_81 = arith.constant 0 : index
    %c0_82 = arith.constant 0 : index
    %188 = vector.load %arg20[%c0_81, %c0_82] : memref<32x32xf32, #tpu.memory_space<vmem>>, vector<32x32xf32>
    %cst_83 = arith.constant dense<0.000000e+00> : vector<2x32xf32>
    %189 = tpu.matmul %187, %188, %cst_83 {dimension_numbers = #tpu.dot_dimension_numbers<[1], [0], [0], [1], [0, 0, 1, 1], [], []>} : vector<2x32xf32>, vector<32x32xf32>, vector<2x32xf32> -> vector<2x32xf32>
    %c0_84 = arith.constant 0 : index
    %c0_85 = arith.constant 0 : index
    %190 = vector.load %arg21[%c0_84, %c0_85] : memref<1x32xf32, #tpu.memory_space<vmem>>, vector<1x32xf32>
    %191 = vector.broadcast %190 : vector<1x32xf32> to vector<2x32xf32>
    %192 = arith.addf %189, %191 : vector<2x32xf32>
    %193 = math.tanh %192 : vector<2x32xf32>
    %c0_86 = arith.constant 0 : index
    %c0_87 = arith.constant 0 : index
    %194 = vector.load %arg22[%c0_86, %c0_87] : memref<32x128xf32, #tpu.memory_space<vmem>>, vector<32x128xf32>
    %cst_88 = arith.constant dense<0.000000e+00> : vector<2x128xf32>
    %195 = tpu.matmul %193, %194, %cst_88 {dimension_numbers = #tpu.dot_dimension_numbers<[1], [0], [0], [1], [0, 0, 1, 1], [], []>} : vector<2x32xf32>, vector<32x128xf32>, vector<2x128xf32> -> vector<2x128xf32>
    %c0_89 = arith.constant 0 : index
    %c0_90 = arith.constant 0 : index
    %196 = vector.load %arg23[%c0_89, %c0_90] : memref<1x128xf32, #tpu.memory_space<vmem>>, vector<1x128xf32>
    %197 = vector.broadcast %196 : vector<1x128xf32> to vector<2x128xf32>
    %198 = arith.addf %195, %197 : vector<2x128xf32>
    %c0_91 = arith.constant 0 : index
    %c0_92 = arith.constant 0 : index
    %199 = vector.load %arg24[%c0_91, %c0_92] : memref<2x128xf32, #tpu.memory_space<vmem>>, vector<2x128xf32>
    tpu.vector_store %arg24[%c0_91, %c0_92], %198 {strides = array<i32>} : memref<2x128xf32, #tpu.memory_space<vmem>>, vector<2x128xf32>,
    return
  }
  func.func @transform_0(%arg0: i32) -> (i32, i32) {
    %c0_i32 = arith.constant 0 : i32
    %c0_i32_0 = arith.constant 0 : i32
    %c0_i32_1 = arith.constant 0 : i32
    return %c0_i32, %c0_i32_0 : i32, i32
  }
  func.func @transform_1(%arg0: i32) -> (i32, i32) {
    %c0_i32 = arith.constant 0 : i32
    %c0_i32_0 = arith.constant 0 : i32
    %c0_i32_1 = arith.constant 0 : i32
    return %c0_i32, %c0_i32_0 : i32, i32
  }
  func.func @transform_2(%arg0: i32) -> (i32, i32) {
    %c0_i32 = arith.constant 0 : i32
    %c0_i32_0 = arith.constant 0 : i32
    %c0_i32_1 = arith.constant 0 : i32
    return %c0_i32, %c0_i32_0 : i32, i32
  }
  func.func @transform_3(%arg0: i32) -> (i32, i32) {
    %c0_i32 = arith.constant 0 : i32
    %c0_i32_0 = arith.constant 0 : i32
    %c0_i32_1 = arith.constant 0 : i32
    return %c0_i32, %c0_i32_0 : i32, i32
  }
  func.func @transform_4(%arg0: i32) -> (i32, i32) {
    %c0_i32 = arith.constant 0 : i32
    %c0_i32_0 = arith.constant 0 : i32
    %c0_i32_1 = arith.constant 0 : i32
    return %c0_i32, %c0_i32_0 : i32, i32
  }
  func.func @transform_5(%arg0: i32) -> (i32, i32) {
    %c0_i32 = arith.constant 0 : i32
    %c0_i32_0 = arith.constant 0 : i32
    %c0_i32_1 = arith.constant 0 : i32
    return %c0_i32, %c0_i32_0 : i32, i32
  }
  func.func @transform_6(%arg0: i32) -> (i32, i32) {
    %c0_i32 = arith.constant 0 : i32
    %c0_i32_0 = arith.constant 0 : i32
    %c0_i32_1 = arith.constant 0 : i32
    return %c0_i32, %c0_i32_0 : i32, i32
  }
  func.func @transform_7(%arg0: i32) -> (i32, i32) {
    %c0_i32 = arith.constant 0 : i32
    %c0_i32_0 = arith.constant 0 : i32
    %c0_i32_1 = arith.constant 0 : i32
    return %c0_i32, %c0_i32_0 : i32, i32
  }
  func.func @transform_8(%arg0: i32) -> (i32, i32) {
    %c0_i32 = arith.constant 0 : i32
    %c0_i32_0 = arith.constant 0 : i32
    %c0_i32_1 = arith.constant 0 : i32
    return %c0_i32, %c0_i32_0 : i32, i32
  }
  func.func @transform_9(%arg0: i32) -> (i32, i32) {
    %c0_i32 = arith.constant 0 : i32
    %c0_i32_0 = arith.constant 0 : i32
    %c0_i32_1 = arith.constant 0 : i32
    return %c0_i32, %c0_i32_0 : i32, i32
  }
  func.func @transform_10(%arg0: i32) -> (i32, i32) {
    %c0_i32 = arith.constant 0 : i32
    %c0_i32_0 = arith.constant 0 : i32
    %c0_i32_1 = arith.constant 0 : i32
    return %c0_i32, %c0_i32_0 : i32, i32
  }
  func.func @transform_11(%arg0: i32) -> (i32, i32) {
    %c0_i32 = arith.constant 0 : i32
    %c0_i32_0 = arith.constant 0 : i32
    %c0_i32_1 = arith.constant 0 : i32
    return %c0_i32, %c0_i32_0 : i32, i32
  }
  func.func @transform_12(%arg0: i32) -> (i32, i32) {
    %c0_i32 = arith.constant 0 : i32
    %c0_i32_0 = arith.constant 0 : i32
    %c0_i32_1 = arith.constant 0 : i32
    return %c0_i32, %c0_i32_0 : i32, i32
  }
  func.func @transform_13(%arg0: i32) -> (i32, i32) {
    %c0_i32 = arith.constant 0 : i32
    %c0_i32_0 = arith.constant 0 : i32
    %c0_i32_1 = arith.constant 0 : i32
    return %c0_i32, %c0_i32_0 : i32, i32
  }
  func.func @transform_14(%arg0: i32) -> (i32, i32) {
    %c0_i32 = arith.constant 0 : i32
    %c0_i32_0 = arith.constant 0 : i32
    %c0_i32_1 = arith.constant 0 : i32
    return %c0_i32, %c0_i32_0 : i32, i32
  }
  func.func @transform_15(%arg0: i32) -> (i32, i32) {
    %c0_i32 = arith.constant 0 : i32
    %c0_i32_0 = arith.constant 0 : i32
    %c0_i32_1 = arith.constant 0 : i32
    return %c0_i32, %c0_i32_0 : i32, i32
  }
  func.func @transform_16(%arg0: i32) -> (i32, i32) {
    %c0_i32 = arith.constant 0 : i32
    %c0_i32_0 = arith.constant 0 : i32
    %c0_i32_1 = arith.constant 0 : i32
    return %c0_i32, %c0_i32_0 : i32, i32
  }
  func.func @transform_17(%arg0: i32) -> (i32, i32) {
    %c0_i32 = arith.constant 0 : i32
    %c0_i32_0 = arith.constant 0 : i32
    %c0_i32_1 = arith.constant 0 : i32
    return %c0_i32, %c0_i32_0 : i32, i32
  }
  func.func @transform_18(%arg0: i32) -> (i32, i32) {
    %c0_i32 = arith.constant 0 : i32
    %c0_i32_0 = arith.constant 0 : i32
    %c0_i32_1 = arith.constant 0 : i32
    return %c0_i32, %c0_i32_0 : i32, i32
  }
  func.func @transform_19(%arg0: i32) -> (i32, i32) {
    %c0_i32 = arith.constant 0 : i32
    %c0_i32_0 = arith.constant 0 : i32
    %c0_i32_1 = arith.constant 0 : i32
    return %c0_i32, %c0_i32_0 : i32, i32
  }
  func.func @transform_20(%arg0: i32) -> (i32, i32) {
    %c0_i32 = arith.constant 0 : i32
    %c0_i32_0 = arith.constant 0 : i32
    %c0_i32_1 = arith.constant 0 : i32
    return %c0_i32, %c0_i32_0 : i32, i32
  }
  func.func @transform_21(%arg0: i32) -> (i32, i32) {
    %c0_i32 = arith.constant 0 : i32
    %c0_i32_0 = arith.constant 0 : i32
    %c0_i32_1 = arith.constant 0 : i32
    return %c0_i32, %c0_i32_0 : i32, i32
  }
  func.func @transform_22(%arg0: i32) -> (i32, i32) {
    %c0_i32 = arith.constant 0 : i32
    %c0_i32_0 = arith.constant 0 : i32
    %c0_i32_1 = arith.constant 0 : i32
    return %c0_i32, %c0_i32_0 : i32, i32
  }
  func.func @transform_23(%arg0: i32) -> (i32, i32) {
    %c0_i32 = arith.constant 0 : i32
    %c0_i32_0 = arith.constant 0 : i32
    %c0_i32_1 = arith.constant 0 : i32
    return %c0_i32, %c0_i32_0 : i32, i32
  }
}

</mosaic_0001>

<bundles_post_ra>
// kernel: bert_spc_forward.1
= control target key start
LH: loop header
LB: loop body
LE: loop exit
PB: predicated region body
PF: predicated region fallthrough
CT: control target
= control target key end

     0   :  { %s2403_s0 = inlined_call_operand.vmem [shape: f32[16,32], index: 0, kind: input, shape index: {}]   ;;  %s2404_s1 = inlined_call_operand.vmem [shape: f32[1,32], index: 1, kind: input, shape index: {}]   ;;  %s2405_s2 = inlined_call_operand.vmem [shape: f32[1,32], index: 2, kind: input, shape index: {}]   ;;  %s2406_s3 = inlined_call_operand.vmem [shape: f32[32,32], index: 3, kind: input, shape index: {}]   ;;  %s2407_s4 = inlined_call_operand.vmem [shape: f32[1,32], index: 4, kind: input, shape index: {}]   ;;  %s2408_s5 = inlined_call_operand.vmem [shape: f32[32,32], index: 5, kind: input, shape index: {}]   ;;  %s2409_s6 = inlined_call_operand.vmem [shape: f32[1,32], index: 6, kind: input, shape index: {}]   ;;  %s2410_s7 = inlined_call_operand.vmem [shape: f32[32,32], index: 7, kind: input, shape index: {}]   ;;  %s2411_s8 = inlined_call_operand.vmem [shape: f32[1,32], index: 8, kind: input, shape index: {}]   ;;  %s2412_s9 = inlined_call_operand.vmem [shape: f32[32,32], index: 9, kind: input, shape index: {}]   ;;  %s2413_s10 = inlined_call_operand.vmem [shape: f32[1,32], index: 10, kind: input, shape index: {}]   ;;  %s2414_s11 = inlined_call_operand.vmem [shape: f32[1,32], index: 11, kind: input, shape index: {}]   ;;  %s2415_s12 = inlined_call_operand.vmem [shape: f32[1,32], index: 12, kind: input, shape index: {}]   ;;  %s2416_s13 = inlined_call_operand.vmem [shape: f32[32,64], index: 13, kind: input, shape index: {}]   ;;  %s2417_s14 = inlined_call_operand.vmem [shape: f32[1,64], index: 14, kind: input, shape index: {}]   ;;  %s2418_s15 = inlined_call_operand.vmem [shape: f32[64,32], index: 15, kind: input, shape index: {}]   ;;  %s2419_s16 = inlined_call_operand.vmem [shape: f32[1,32], index: 16, kind: input, shape index: {}]   ;;  %s2420_s17 = inlined_call_operand.vmem [shape: f32[1,32], index: 17, kind: input, shape index: {}]   ;;  %s2421_s18 = inlined_call_operand.vmem [shape: f32[1,32], index: 18, kind: input, shape index: {}]   ;;  %s2422_s19 = inlined_call_operand.vmem [shape: f32[32,32], index: 19, kind: input, shape index: {}]   ;;  %s2423_s20 = inlined_call_operand.vmem [shape: f32[1,32], index: 20, kind: input, shape index: {}]   ;;  %s2424_s21 = inlined_call_operand.vmem [shape: f32[32,128], index: 21, kind: input, shape index: {}]   ;;  %s2425_s22 = inlined_call_operand.vmem [shape: f32[1,128], index: 22, kind: input, shape index: {}]   ;;  %s2426_s23 = inlined_call_operand.hbm [shape: f32[2,128], index: 23, kind: output, shape index: {}]  }
   0x1   :  { %2431 = sst [smem:[#allocation5_spill]] %s2403_s0 }
   0x2   :  { %2432 = sst [smem:[#allocation6_spill]] %s2404_s1 }
   0x3   :  { %2433 = sst [smem:[#allocation7_spill]] %s2405_s2 }
   0x4   :  { %2434 = sst [smem:[#allocation8_spill]] %s2406_s3 }
   0x5   :  { %2435 = sst [smem:[#allocation9_spill]] %s2407_s4 }
   0x6   :  { %2436 = sst [smem:[#allocation10_spill]] %s2408_s5 }
   0x7   :  { %2437 = sst [smem:[#allocation11_spill]] %s2409_s6 }
   0x8   :  { %2438 = sst [smem:[#allocation12_spill]] %s2410_s7 }
   0x9   :  { %s2439_s24 = sld [smem:[#allocation5_spill]]  ;;  %vm79_vm0 = vcmask 261120  }
   0xf   :  { %v75_v0 = vld [vmem:[%s2439_s24] sm:$0xff]  ;;  %v76_v1 = vld [vmem:[%s2439_s24 + $0x8] sm:$0xff] }
  0x10   :  { %28 = vsyncpa [#allocation3], 0  ;;  %v80_v2 = vsel %vm79_vm0, %v75_v0, 0.0  ;;  %v83_v3 = vsel %vm79_vm0, %v76_v1, 0.0  ;;  %s2440_s2 = sld [smem:[#allocation8_spill]]  ;;  %s2441_s29 = sld [smem:[#allocation10_spill]] }
  0x11   :  { %81 = vadd.xlane.f32.xlu0 %v80_v2  ;;  %s2442_s7 = sld [smem:[#allocation12_spill]]  ;;  %s2443_s4 = sld [smem:[#allocation6_spill]]  ;;  %v2009_v48 = vmov 0.0   ;;  %vm2010_vm1 = vmmov 0   ;;  %vm387_vm2 = vcmask 130048   ;;  %vm465_vm3 = vcmask 64512  }
  0x12   :  { %s2444_s25 = sld [smem:[#allocation7_spill]]  ;;  %s2011_s0 = smov 112   ;;  %v1643_v57 = vld [vmem:[%s2411_s8] ss:$0 sm:$0xff]  ;;  %vm1318_vm4 = vcmask 523264   ;;  %vm1449_vm5 = vcmask 1040384  }
  0x15   :  { %84 = vadd.xlane.f32.xlu0 %v83_v3 }
  0x16   :  { %v123_v14 = vld [vmem:[%s2440_s2] sm:$0xff]  ;;  %v124_v15 = vld [vmem:[%s2440_s2 + $0x8] sm:$0xff]  ;;  %v125_v19 = vld [vmem:[%s2440_s2 + $0x10] sm:$0xff] }
  0x17   :  { %v215_v16 = vld [vmem:[%s2441_s29] sm:$0xff]  ;;  %v1877_v17 = vpack.c.bf16 %v124_v15, %v123_v14  ;;  %v216_v18 = vld [vmem:[%s2441_s29 + $0x8] sm:$0xff]  ;;  %v126_v20 = vld [vmem:[%s2440_s2 + $0x18] sm:$0xff]  ;;  %s2012_s2 = smov 16  }
  0x18   :  { %v1885_v21 = vpack.c.bf16 %v216_v18, %v215_v16  ;;  %v1881_v22 = vpack.c.bf16 %v126_v20, %v125_v19  ;;  %v217_v23 = vld [vmem:[%s2441_s29 + $0x10] sm:$0xff]  ;;  %v218_v24 = vld [vmem:[%s2441_s29 + $0x18] sm:$0xff]  ;;  %v301_v26 = vld [vmem:[%s2442_s7] sm:$0xff]  ;;  %s2446_s29 = sld [smem:[#allocation11_spill]] }
  0x19   :  { %1878 = vmatprep.subr.bf16.mxu0 %v1877_v17  ;;  %v1889_v25 = vpack.c.bf16 %v218_v24, %v217_v23  ;;  %v302_v27 = vld [vmem:[%s2442_s7 + $0x8] sm:$0xff]  ;;  %v1635_v36 = vld [vmem:[%s2443_s4] ss:$0 sm:$0xff]  ;;  %v303_v43 = vld [vmem:[%s2442_s7 + $0x10] sm:$0xff] }
  0x1a   :  { %1880 = vmatpush3.bf16.msra.mxu0 %v1877_v17  ;;  %1886 = vmatprep.subr.bf16.mxu1 %v1885_v21  ;;  %v1893_v28 = vpack.c.bf16 %v302_v27, %v301_v26  ;;  %v1636_v38 = vld [vmem:[%s2444_s25] ss:$0 sm:$0xff]  ;;  %v304_v44 = vld [vmem:[%s2442_s7 + $0x18] sm:$0xff]  ;;  %s2445_s7 = sld [smem:[#allocation9_spill]] }
  0x1b   :  { %1888 = vmatpush3.bf16.msra.mxu1 %v1885_v21  ;;  %1882 = vmatprep.subr.bf16.mxu0 %v1881_v22  ;;  %v1897_v47 = vpack.c.bf16 %v304_v44, %v303_v43 }
  0x1c   :  { %1890 = vmatprep.subr.bf16.mxu1 %v1889_v25 }
  0x1e   :  { %1884 = vmatpush3.bf16.msra.mxu0 %v1881_v22  ;;  %v1640_v50 = vld [vmem:[%s2446_s29] ss:$0 sm:$0xff] }
  0x1f   :  { %1892 = vmatpush3.bf16.msra.mxu1 %v1889_v25  ;;  %1894 = vmatprep.subr.bf16.mxu0 %v1893_v28 }
  0x20   :  { %1774 = vmatprep.subr.mxu1 %v2009_v48  ;;  %v1637_v49 = vld [vmem:[%s2445_s7] ss:$0 sm:$0xff] }
  0x9e   :  { %v82_v4 = vpop.xlane.xlu0 %81 }
  0x9f   :  { %v87_v5 = vmul.f32 0.03125, %v82_v4 }
  0xa1   :  { %v89_v6 = vsub.f32 %v75_v0, %v87_v5 }
  0xa2   :  { %v85_v7 = vpop.xlane.xlu0 %84 }
  0xa3   :  { %v88_v8 = vmul.f32 0.03125, %v85_v7  ;;  %v91_v9 = vmul.f32 %v89_v6, %v89_v6 }
  0xa5   :  { %v90_v10 = vsub.f32 %v76_v1, %v88_v8  ;;  %v93_v11 = vsel %vm79_vm0, %v91_v9, 0.0 }
  0xa6   :  { %94 = vadd.xlane.f32.xlu1 %v93_v11 }
  0xa7   :  { %v92_v12 = vmul.f32 %v90_v10, %v90_v10 }
  0xa9   :  { %v96_v13 = vsel %vm79_vm0, %v92_v12, 0.0 }
  0xaa   :  { %97 = vadd.xlane.f32.xlu1 %v96_v13 }
 0x133   :  { %v95_v29 = vpop.xlane.xlu1 %94 }
 0x134   :  { %v99_v30 = vmul.f32 0.03125, %v95_v29 }
 0x136   :  { %v101_v31 = vadd.f32 1e-12, %v99_v30 }
 0x137   :  { %v98_v32 = vpop.xlane.xlu1 %97 }
 0x138   :  { %1951 = vrsqrt.f32 %v101_v31  ;;  %v100_v33 = vmul.f32 0.03125, %v98_v32 }
 0x13a   :  { %v102_v34 = vadd.f32 1e-12, %v100_v33 }
 0x13c   :  { %1953 = vrsqrt.f32 %v102_v34 }
 0x142   :  { %v1952_v35 = vpop.eup %1951 }
 0x143   :  { %v105_v37 = vmul.f32 %v1952_v35, %v89_v6 }
 0x145   :  { %v113_v39 = vmul.f32 %v1635_v36, %v105_v37 }
 0x146   :  { %v1954_v40 = vpop.eup %1953 }
 0x147   :  { %v2181_v41 = vadd.f32 %v1636_v38, %v113_v39  ;;  %v106_v42 = vmul.f32 %v1954_v40, %v90_v10 }
 0x149   :  { %1749 = vmatprep.mubr.msk.f32.mxu0 %vm79_vm0, %v2181_v41  ;;  %1760 = vmatprep.mubr.msk.f32.mxu1 %vm79_vm0, %v2181_v41  ;;  %v114_v45 = vmul.f32 %v1635_v36, %v106_v42 }
 0x14b   :  { %v2193_v46 = vadd.f32 %v1636_v38, %v114_v45 }
 0x14d   :  { %1750 = vmatmul.mubr.msk.f32.vlgmr.msra.gmra.mrb[0].mxu0 %vm79_vm0, %v2193_v46  ;;  %1761 = vmatmul.mubr.msk.f32.vlgmr.msra.gmra.mrb[0].mxu1 %vm79_vm0, %v2193_v46 }
 0x14e   :  { %1896 = vmatpush3.bf16.msra.mxu0 %v1893_v28  ;;  %1771 = vmatprep.mubr.msk.f32.mxu0 %vm79_vm0, %v2181_v41 }
 0x14f   :  { %1898 = vmatprep.subr.bf16.mxu0 %v1897_v47  ;;  %1776 = vmatprep.mubr.msk.f32.mxu1 %vm2010_vm1, %v2009_v48 }
 0x152   :  { %1900 = vmatpush3.bf16.msra.mxu0 %v1897_v47 }
 0x153   :  { %1784 = vmatprep.subr.mxu0 %v2009_v48 }
 0x155   :  { %1772 = vmatmul.mubr.msk.f32.vlgmr.msra.gmra.mrb[2].mxu0 %vm79_vm0, %v2193_v46 }
 0x156   :  { %1786 = vmatprep.mubr.msk.f32.mxu0 %vm2010_vm1, %v2009_v48 }
 0x220   :  { %v1751_v51 = vpop.f32.mrb[0].mxu0  ;;  %v1762_v52 = vpop.f32.mrb[0].mxu1 }
 0x221   :  { %v206_v53 = vpop.f32.mrb[1].mxu0  ;;  %v292_v54 = vpop.f32.mrb[1].mxu1  ;;  %v298_v58 = vadd.f32 %v1762_v52, %v1640_v50  ;;  %v212_v63 = vadd.f32 %v1751_v51, %v1637_v49 }
 0x222   :  { %v207_v55 = vadd.f32 %v1637_v49, %v206_v53  ;;  %v293_v56 = vadd.f32 %v1640_v50, %v292_v54 }
 0x224   :  { %552 = vrot.lane.b32.xlu0 %v293_v56, %s2011_s0  ;;  %1775 = vmatpush3.xpose.msk.msra.mxu1 %vm387_vm2, %v293_v56 }
 0x225   :  { %550 = vrot.lane.b32.xlu1 %v207_v55, %s2011_s0  ;;  %1779 = vmatprep.subr.mxu1 %v2009_v48 }
 0x227   :  { %1777 = vmatmul.mubr.msk.f32.vlgmr.msra.gmra.mrb[2].mxu1 %vm387_vm2, %v207_v55 }
 0x228   :  { %v1773_v59 = vpop.f32.mrb[2].mxu0  ;;  %1781 = vmatprep.mubr.msk.f32.mxu1 %vm2010_vm1, %v2009_v48 }
 0x229   :  { %v2225_v60 = vadd.f32 %v1773_v59, %v1643_v57  ;;  %v378_v61 = vpop.f32.mrb[3].mxu0  ;;  %885 = vrot.lane.b32.xlu1 %v298_v58, %s2011_s0  ;;  %v1055_v59 = vld [vmem:[%s2412_s9] sm:$0xff] }
 0x22a   :  { %v2228_v62 = vadd.f32 %v1643_v57, %v378_v61 }
 0x22c   :  { %1780 = vmatpush3.msra.mxu1 %v2228_v62 }
 0x22d   :  { %883 = vrot.lane.b32.xlu1 %v212_v63, %s2011_s0  ;;  %1789 = vmatprep.subr.mxu1 %v2009_v48 }
 0x296   :  { %v553_v0 = vpop.permute.xlu0 %552 }
 0x297   :  { %v551_v1 = vpop.permute.xlu1 %550  ;;  %1785 = vmatpush3.xpose.msk.msra.mxu0 %vm387_vm2, %v553_v0 }
 0x298   :  { %1794 = vmatprep.subr.mxu0 %v2009_v48 }
 0x29a   :  { %1787 = vmatmul.mubr.msk.f32.vlgmr.msra.gmra.mrb[4].mxu0 %vm387_vm2, %v551_v1 }
 0x29b   :  { %v886_v2 = vpop.permute.xlu1 %885  ;;  %1795 = vmatpush3.xpose.msk.msra.mxu0 %vm387_vm2, %v298_v58  ;;  %1796 = vmatprep.mubr.msk.f32.mxu0 %vm2010_vm1, %v2009_v48 }
 0x29c   :  { %1804 = vmatprep.subr.mxu0 %v2009_v48 }
 0x29e   :  { %1797 = vmatmul.mubr.msk.f32.vlgmr.msra.gmra.mrb[6].mxu0 %vm387_vm2, %v212_v63  ;;  %v1058_v63 = vld [vmem:[%s2412_s9 + $0x18] sm:$0xff] }
 0x29f   :  { %1805 = vmatpush3.xpose.msk.msra.mxu0 %vm387_vm2, %v886_v2  ;;  %1806 = vmatprep.mubr.msk.f32.mxu0 %vm2010_vm1, %v2009_v48  ;;  %v884_v3 = vpop.permute.xlu1 %883 }
 0x2a2   :  { %1807 = vmatmul.mubr.msk.f32.vlgmr.msra.gmra.mrb[8].mxu0 %vm387_vm2, %v884_v3 }
 0x2fa   :  { %v460_v4 = vpop.f32.mrb[2].mxu1 }
 0x2fb   :  { %v464_v5 = vmul.f32 0.25, %v460_v4  ;;  %v1778_v6 = vpop.f32.mrb[3].mxu1 }
 0x2fd   :  { %v466_v7 = vsel %vm465_vm3, %v464_v5, -inf }
 0x2fe   :  { %467 = vmax.xlane.f32.xlu0 %v466_v7 }
 0x36d   :  { %v624_v8 = vpop.f32.mrb[4].mxu0 }
 0x36e   :  { %v628_v9 = vmul.f32 0.25, %v624_v8  ;;  %v1788_v10 = vpop.f32.mrb[5].mxu0 }
 0x370   :  { %v629_v11 = vsel %vm465_vm3, %v628_v9, -inf }
 0x371   :  { %630 = vmax.xlane.f32.xlu1 %v629_v11  ;;  %v794_v12 = vpop.f32.mrb[6].mxu0  ;;  %v1658_v11 = vld [vmem:[%s2413_s10] ss:$0 sm:$0xff] }
 0x372   :  { %v798_v13 = vmul.f32 0.25, %v794_v12  ;;  %v1798_v14 = vpop.f32.mrb[7].mxu0 }
 0x374   :  { %v799_v15 = vsel %vm465_vm3, %v798_v13, -inf }
 0x375   :  { %v957_v16 = vpop.f32.mrb[8].mxu0  ;;  %800 = vmax.xlane.f32.xlu0 %v799_v15 }
 0x376   :  { %v961_v17 = vmul.f32 0.25, %v957_v16  ;;  %v1808_v18 = vpop.f32.mrb[9].mxu0 }
 0x378   :  { %v962_v19 = vsel %vm465_vm3, %v961_v17, -inf }
 0x379   :  { %963 = vmax.xlane.f32.xlu0 %v962_v19 }
 0x38b   :  { %v468_v20 = vpop.xlane.xlu0 %467 }
 0x38c   :  { %v469_v21 = vsub.f32 %v464_v5, %v468_v20 }
 0x38e   :  { %v470_v22 = vmul.f32 1.442695, %v469_v21 }
 0x390   :  { %1955 = vpow2.f32 %v470_v22 }
 0x39a   :  { %v1956_v23 = vpop.eup %1955 }
 0x39b   :  { %v472_v24 = vsel %vm465_vm3, %v1956_v23, 0.0 }
 0x39c   :  { %473 = vadd.xlane.f32.xlu0 %v472_v24 }
 0x3fe   :  { %v631_v25 = vpop.xlane.xlu1 %630 }
 0x3ff   :  { %v632_v26 = vsub.f32 %v628_v9, %v631_v25 }
 0x401   :  { %v633_v27 = vmul.f32 1.442695, %v632_v26 }
 0x402   :  { %v801_v28 = vpop.xlane.xlu0 %800 }
 0x403   :  { %1957 = vpow2.f32 %v633_v27  ;;  %v802_v29 = vsub.f32 %v798_v13, %v801_v28 }
 0x405   :  { %v803_v30 = vmul.f32 1.442695, %v802_v29  ;;  %v1194_v29 = vld [vmem:[%s2416_s13 + $0x8] sm:$0xff] }
 0x406   :  { %v964_v31 = vpop.xlane.xlu0 %963 }
 0x407   :  { %1959 = vpow2.f32 %v803_v30  ;;  %v965_v32 = vsub.f32 %v961_v17, %v964_v31  ;;  %v1195_v31 = vld [vmem:[%s2416_s13 + $0x10] sm:$0xff] }
 0x409   :  { %v966_v33 = vmul.f32 1.442695, %v965_v32  ;;  %v1196_v32 = vld [vmem:[%s2416_s13 + $0x18] sm:$0xff] }
 0x40b   :  { %1961 = vpow2.f32 %v966_v33  ;;  %v1913_v33 = vpack.c.bf16 %v1196_v32, %v1195_v31 }
 0x40d   :  { %v1958_v34 = vpop.eup %1957 }
 0x40e   :  { %v635_v35 = vsel %vm465_vm3, %v1958_v34, 0.0 }
 0x40f   :  { %636 = vadd.xlane.f32.xlu1 %v635_v35 }
 0x411   :  { %v1960_v36 = vpop.eup %1959 }
 0x412   :  { %v805_v37 = vsel %vm465_vm3, %v1960_v36, 0.0 }
 0x413   :  { %806 = vadd.xlane.f32.xlu0 %v805_v37 }
 0x415   :  { %v1962_v38 = vpop.eup %1961 }
 0x416   :  { %v968_v39 = vsel %vm465_vm3, %v1962_v38, 0.0 }
 0x417   :  { %969 = vadd.xlane.f32.xlu1 %v968_v39 }
 0x428   :  { %974 = vrot.lane.b32.xlu1 %v2225_v60, %s2011_s0 }
 0x429   :  { %641 = vrot.lane.b32.xlu0 %v2228_v62, %s2011_s0  ;;  %v474_v40 = vpop.xlane.xlu0 %473  ;;  %v1057_v62 = vld [vmem:[%s2412_s9 + $0x10] sm:$0xff] }
 0x42a   :  { %1963 = vrcp.f32 %v474_v40  ;;  %v1905_v0 = vpack.c.bf16 %v1058_v63, %v1057_v62  ;;  %v1309_v62 = vld [vmem:[%s2418_s15 + $0x30] sm:$0xff]  ;;  %v1310_v63 = vld [vmem:[%s2418_s15 + $0x38] sm:$0xff] }
 0x434   :  { %v1964_v42 = vpop.eup %1963 }
 0x435   :  { %v476_v43 = vmul.f32 %v1964_v42, %v1956_v23  ;;  %v1661_v42 = vld [vmem:[%s2414_s11] ss:$0 sm:$0xff] }
 0x437   :  { %1782 = vmatmul.mubr.msk.f32.vlgmr.msra.gmra.mrb[4].mxu1 %vm465_vm3, %v476_v43 }
 0x438   :  { %1791 = vmatprep.mubr.msk.f32.mxu1 %vm2010_vm1, %v2009_v48 }
 0x49c   :  { %v637_v44 = vpop.xlane.xlu1 %636 }
 0x49d   :  { %1965 = vrcp.f32 %v637_v44  ;;  %v1662_v44 = vld [vmem:[%s2415_s12] ss:$0 sm:$0xff] }
 0x4a0   :  { %v807_v45 = vpop.xlane.xlu0 %806 }
 0x4a1   :  { %1967 = vrcp.f32 %v807_v45 }
 0x4a4   :  { %v970_v47 = vpop.xlane.xlu1 %969  ;;  %v642_v49 = vpop.permute.xlu0 %641 }
 0x4a5   :  { %1969 = vrcp.f32 %v970_v47  ;;  %1790 = vmatpush3.msra.mxu1 %v642_v49 }
 0x4a6   :  { %1799 = vmatprep.subr.mxu1 %v2009_v48 }
 0x4a7   :  { %v1966_v50 = vpop.eup %1965 }
 0x4a8   :  { %v639_v51 = vmul.f32 %v1966_v50, %v1958_v34  ;;  %v975_v54 = vpop.permute.xlu1 %974 }
 0x4aa   :  { %1792 = vmatmul.mubr.msk.f32.vlgmr.msra.gmra.mrb[6].mxu1 %vm465_vm3, %v639_v51 }
 0x4ab   :  { %v1968_v52 = vpop.eup %1967  ;;  %1800 = vmatpush3.msra.mxu1 %v2225_v60  ;;  %1801 = vmatprep.mubr.msk.f32.mxu1 %vm2010_vm1, %v2009_v48  ;;  %v1056_v60 = vld [vmem:[%s2412_s9 + $0x8] sm:$0xff] }
 0x4ac   :  { %v809_v53 = vmul.f32 %v1968_v52, %v1960_v36  ;;  %1809 = vmatprep.subr.mxu1 %v2009_v48  ;;  %v1901_v61 = vpack.c.bf16 %v1056_v60, %v1055_v59  ;;  %v1307_v59 = vld [vmem:[%s2418_s15 + $0x20] sm:$0xff]  ;;  %v1308_v60 = vld [vmem:[%s2418_s15 + $0x28] sm:$0xff] }
 0x4ae   :  { %1802 = vmatmul.mubr.msk.f32.vlgmr.msra.gmra.mrb[8].mxu1 %vm465_vm3, %v809_v53  ;;  %1902 = vmatprep.subr.bf16.mxu0 %v1901_v61  ;;  %v1303_v53 = vld [vmem:[%s2418_s15] sm:$0xff] }
 0x4af   :  { %v1970_v55 = vpop.eup %1969  ;;  %1810 = vmatpush3.msra.mxu1 %v975_v54  ;;  %1811 = vmatprep.mubr.msk.f32.mxu1 %vm2010_vm1, %v2009_v48  ;;  %v1304_v54 = vld [vmem:[%s2418_s15 + $0x8] sm:$0xff] }
 0x4b0   :  { %v972_v56 = vmul.f32 %v1970_v55, %v1962_v38  ;;  %1904 = vmatpush3.bf16.msra.mxu0 %v1901_v61  ;;  %v1917_v55 = vpack.c.bf16 %v1304_v54, %v1303_v53  ;;  %v1925_v61 = vpack.c.bf16 %v1308_v60, %v1307_v59 }
 0x4b1   :  { %1906 = vmatprep.subr.bf16.mxu0 %v1905_v0 }
 0x4b2   :  { %1812 = vmatmul.mubr.msk.f32.vlgmr.msra.gmra.mrb[10].mxu1 %vm465_vm3, %v972_v56  ;;  %v1305_v56 = vld [vmem:[%s2418_s15 + $0x10] sm:$0xff] }
 0x4b4   :  { %1908 = vmatpush3.bf16.msra.mxu0 %v1905_v0  ;;  %v1929_v0 = vpack.c.bf16 %v1310_v63, %v1309_v62  ;;  %v1670_v62 = vld [vmem:[%s2421_s18] ss:$0 sm:$0xff] }
 0x4b5   :  { %1918 = vmatprep.subr.bf16.mxu0 %v1917_v55 }
 0x50a   :  { %v546_v57 = vpop.f32.mrb[4].mxu1 }
 0x50b   :  { %v1783_v58 = vpop.f32.mrb[5].mxu1 }
 0x57d   :  { %v713_v1 = vpop.f32.mrb[6].mxu1 }
 0x57e   :  { %718 = vrot.lane.b32.xlu1 %v713_v1, %s2012_s2  ;;  %v1793_v2 = vpop.f32.mrb[7].mxu1  ;;  %v1663_v1 = vld [vmem:[%s2417_s14] ss:$0 sm:$0xff] }
 0x581   :  { %v879_v3 = vpop.f32.mrb[8].mxu1 }
 0x582   :  { %v1803_v4 = vpop.f32.mrb[9].mxu1 }
 0x585   :  { %v1046_v5 = vpop.f32.mrb[10].mxu1 }
 0x586   :  { %1051 = vrot.lane.b32.xlu1 %v1046_v5, %s2012_s2  ;;  %v1813_v6 = vpop.f32.mrb[11].mxu1 }
 0x5f0   :  { %v719_v7 = vpop.permute.xlu1 %718 }
 0x5f1   :  { %v721_v8 = vsel %vm387_vm2, %v546_v57, %v719_v7  ;;  %v1306_v57 = vld [vmem:[%s2418_s15 + $0x18] sm:$0xff] }
 0x5f2   :  { %1822 = vmatprep.mubr.msk.f32.mxu0 %vm79_vm0, %v721_v8  ;;  %v1921_v58 = vpack.c.bf16 %v1306_v57, %v1305_v56 }
 0x5f8   :  { %v1052_v9 = vpop.permute.xlu1 %1051 }
 0x5f9   :  { %v1054_v10 = vsel %vm387_vm2, %v879_v3, %v1052_v9 }
 0x5fa   :  { %1823 = vmatmul.mubr.msk.f32.vlgmr.msra.gmra.mrb[10].mxu0 %vm79_vm0, %v1054_v10 }
 0x5fb   :  { %1920 = vmatpush3.bf16.msra.mxu0 %v1917_v55 }
 0x5fc   :  { %1922 = vmatprep.subr.bf16.mxu0 %v1921_v58 }
 0x5ff   :  { %1924 = vmatpush3.bf16.msra.mxu0 %v1921_v58  ;;  %v1669_v58 = vld [vmem:[%s2420_s17] ss:$0 sm:$0xff] }
 0x600   :  { %1926 = vmatprep.subr.bf16.mxu0 %v1925_v61 }
 0x603   :  { %1928 = vmatpush3.bf16.msra.mxu0 %v1925_v61 }
 0x604   :  { %1930 = vmatprep.subr.bf16.mxu0 %v1929_v0 }
 0x607   :  { %1932 = vmatpush3.bf16.msra.mxu0 %v1929_v0 }
 0x6cd   :  { %v1824_v12 = vpop.f32.mrb[10].mxu0 }
 0x6ce   :  { %v1144_v13 = vadd.f32 %v1824_v12, %v1658_v11  ;;  %v1138_v14 = vpop.f32.mrb[11].mxu0 }
 0x6cf   :  { %v1139_v15 = vadd.f32 %v1658_v11, %v1138_v14 }
 0x6d0   :  { %v1148_v16 = vadd.f32 %v1144_v13, %v2193_v46 }
 0x6d1   :  { %v1147_v17 = vadd.f32 %v1139_v15, %v2181_v41  ;;  %v1193_v41 = vld [vmem:[%s2416_s13] sm:$0xff] }
 0x6d2   :  { %v1154_v18 = vsel %vm79_vm0, %v1148_v16, 0.0  ;;  %v1909_v30 = vpack.c.bf16 %v1194_v29, %v1193_v41 }
 0x6d3   :  { %1155 = vadd.xlane.f32.xlu1 %v1154_v18  ;;  %v1151_v19 = vsel %vm79_vm0, %v1147_v17, 0.0 }
 0x6d4   :  { %1152 = vadd.xlane.f32.xlu0 %v1151_v19  ;;  %1910 = vmatprep.subr.bf16.mxu1 %v1909_v30 }
 0x6d5   :  { %1912 = vmatpush3.bf16.msra.mxu1 %v1909_v30 }
 0x6d6   :  { %1914 = vmatprep.subr.bf16.mxu1 %v1913_v33 }
 0x6d9   :  { %1916 = vmatpush3.bf16.msra.mxu1 %v1913_v33 }
 0x760   :  { %v1156_v20 = vpop.xlane.xlu1 %1155 }
 0x761   :  { %v1158_v21 = vmul.f32 0.03125, %v1156_v20  ;;  %v1153_v22 = vpop.xlane.xlu0 %1152 }
 0x762   :  { %v1157_v23 = vmul.f32 0.03125, %v1153_v22 }
 0x763   :  { %v1160_v24 = vsub.f32 %v1148_v16, %v1158_v21 }
 0x764   :  { %v1159_v25 = vsub.f32 %v1147_v17, %v1157_v23 }
 0x765   :  { %v1162_v28 = vmul.f32 %v1160_v24, %v1160_v24 }
 0x766   :  { %v1161_v26 = vmul.f32 %v1159_v25, %v1159_v25 }
 0x767   :  { %v1166_v46 = vsel %vm79_vm0, %v1162_v28, 0.0 }
 0x768   :  { %v1163_v27 = vsel %vm79_vm0, %v1161_v26, 0.0 }
 0x769   :  { %1164 = vadd.xlane.f32.xlu0 %v1163_v27 }
 0x76d   :  { %1167 = vadd.xlane.f32.xlu0 %v1166_v46 }
 0x7f6   :  { %v1165_v34 = vpop.xlane.xlu0 %1164 }
 0x7f7   :  { %v1169_v35 = vmul.f32 0.03125, %v1165_v34 }
 0x7f9   :  { %v1171_v36 = vadd.f32 1e-12, %v1169_v35 }
 0x7fa   :  { %v1168_v37 = vpop.xlane.xlu0 %1167 }
 0x7fb   :  { %1971 = vrsqrt.f32 %v1171_v36  ;;  %v1170_v38 = vmul.f32 0.03125, %v1168_v37 }
 0x7fd   :  { %v1172_v39 = vadd.f32 1e-12, %v1170_v38 }
 0x7ff   :  { %1973 = vrsqrt.f32 %v1172_v39 }
 0x805   :  { %v1972_v40 = vpop.eup %1971 }
 0x806   :  { %v1175_v43 = vmul.f32 %v1972_v40, %v1159_v25 }
 0x808   :  { %v1183_v45 = vmul.f32 %v1661_v42, %v1175_v43  ;;  %v1452_v43 = vld [vmem:[%s2422_s19 + $0x8] sm:$0xff] }
 0x809   :  { %v1974_v47 = vpop.eup %1973 }
 0x80a   :  { %v1176_v49 = vmul.f32 %v1974_v47, %v1160_v24  ;;  %v1191_v50 = vadd.f32 %v1662_v44, %v1183_v45  ;;  %v1666_v24 = vld [vmem:[%s2419_s16] ss:$0 sm:$0xff]  ;;  %v1453_v45 = vld [vmem:[%s2422_s19 + $0x10] sm:$0xff]  ;;  %v1454_v47 = vld [vmem:[%s2422_s19 + $0x18] sm:$0xff] }
 0x80c   :  { %v1184_v51 = vmul.f32 %v1661_v42, %v1176_v49  ;;  %1833 = vmatprep.mubr.msk.f32.mxu1 %vm79_vm0, %v1191_v50  ;;  %v1451_v42 = vld [vmem:[%s2422_s19] sm:$0xff]  ;;  %v2013_v49 = vmov 0.0|0.0  }
 0x80d   :  { %1933 = vmatprep.subr.bf16.mxu1 %v2013_v49 }
 0x80e   :  { %v1192_v52 = vadd.f32 %v1662_v44, %v1184_v51  ;;  %v1934_v44 = vpack.c.bf16 %v1452_v43, %v1451_v42 }
 0x810   :  { %1834 = vmatmul.mubr.msk.f32.vlgmr.msra.gmra.mrb[12].mxu1 %vm79_vm0, %v1192_v52 }
 0x811   :  { %1863 = vmatprep.mubr.msk.f32.mxu1 %vm2010_vm1, %v2009_v48  ;;  %1935 = vmatpush3.bf16.msra.mxu1 %v1934_v44 }
 0x812   :  { %1936 = vmatprep.subr.bf16.mxu1 %v2013_v49 }
 0x8e3   :  { %v1835_v2 = vpop.f32.mrb[12].mxu1 }
 0x8e4   :  { %v1282_v3 = vadd.f32 %v1835_v2, %v1663_v1  ;;  %v1276_v4 = vpop.f32.mrb[13].mxu1 }
 0x8e5   :  { %v1277_v5 = vadd.f32 %v1663_v1, %v1276_v4 }
 0x8e6   :  { %v1288_v6 = vmul.f32 0.044715, %v1282_v3  ;;  %v1286_v21 = vmul.f32 0.5, %v1282_v3 }
 0x8e7   :  { %v1287_v7 = vmul.f32 0.044715, %v1277_v5  ;;  %v1285_v19 = vmul.f32 0.5, %v1277_v5 }
 0x8e8   :  { %v1290_v8 = vmul.f32 %v1288_v6, %v1282_v3  ;;  %v1537_v6 = vld [vmem:[%s2424_s21 + $0x8] sm:$0xff] }
 0x8e9   :  { %v1289_v9 = vmul.f32 %v1287_v7, %v1277_v5  ;;  %v1538_v7 = vld [vmem:[%s2424_s21 + $0x10] sm:$0xff] }
 0x8ea   :  { %v1292_v10 = vmul.f32 %v1290_v8, %v1282_v3 }
 0x8eb   :  { %v1291_v11 = vmul.f32 %v1289_v9, %v1277_v5  ;;  %v1539_v9 = vld [vmem:[%s2424_s21 + $0x18] sm:$0xff] }
 0x8ec   :  { %v1294_v12 = vadd.f32 %v1292_v10, %v1282_v3  ;;  %v1943_v10 = vpack.c.bf16 %v1539_v9, %v1538_v7 }
 0x8ed   :  { %v1293_v13 = vadd.f32 %v1291_v11, %v1277_v5  ;;  %v1536_v5 = vld [vmem:[%s2424_s21] sm:$0xff]  ;;  %s2014_s21 = smov [#allocation2]  }
 0x8ee   :  { %v1296_v14 = vmul.f32 0.7978846, %v1294_v12  ;;  %v1940_v8 = vpack.c.bf16 %v1537_v6, %v1536_v5  ;;  %s1627_s24 = sshll.u32 %s2014_s21, 4  ;;  %s1628_s24 = int_to_ptr.vmem [resolvable:$true] %s1627_s24 }
 0x8ef   :  { %v1295_v15 = vmul.f32 0.7978846, %v1293_v13  ;;  %s1985_s14 = scalar_lea.vmem %s1628_s24, 32  ;;  %p1990_p1 = scmp.lt.s32.totalorder %s1628_s24, %s1628_s24 }
 0x8f0   :  { %1975 = vtanh.f32 %v1296_v14  ;;  %p1986_p0 = scmp.ne.s32.totalorder %s1628_s24, %s1985_s14  ;;  %p1991_p2 = scmp.lt.s32.totalorder %s1985_s14, %s1985_s14 }
 0x8f1   :  { %1977 = vtanh.f32 %v1295_v15  ;;  %v1673_v15 = vld [vmem:[%s2425_s22] ss:$0 sm:$0xff] }
 0x8f2   :  { %p1992_p3 = por %p1991_p2, %p1990_p1 }
 0x8f4   :  { %p1993_p4 = pnand %p1992_p3, %p1986_p0 }
 0x8fa   :  { %v1976_v16 = vpop.eup %1975 }
 0x8fb   :  { %v1978_v17 = vpop.eup %1977  ;;  %v1300_v18 = vadd.f32 1.0, %v1976_v16 }
 0x8fc   :  { %v1299_v20 = vadd.f32 1.0, %v1978_v17 }
 0x8fd   :  { %v1302_v23 = vmul.f32 %v1300_v18, %v1286_v21 }
 0x8fe   :  { %v1301_v22 = vmul.f32 %v1299_v20, %v1285_v19 }
 0x900   :  { %1852 = vmatprep.mubr.msk.f32.mxu0 %vm1318_vm4, %v1301_v22 }
 0x901   :  { %1853 = vmatmul.mubr.msk.f32.vlgmr.msra.gmra.mrb[12].mxu0 %vm1318_vm4, %v1302_v23 }
 0x9d4   :  { %v1854_v25 = vpop.f32.mrb[12].mxu0 }
 0x9d5   :  { %v1397_v26 = vadd.f32 %v1854_v25, %v1666_v24  ;;  %v1391_v27 = vpop.f32.mrb[13].mxu0 }
 0x9d6   :  { %v1392_v28 = vadd.f32 %v1666_v24, %v1391_v27 }
 0x9d7   :  { %v1401_v46 = vadd.f32 %v1397_v26, %v1192_v52 }
 0x9d8   :  { %v1400_v41 = vadd.f32 %v1392_v28, %v1191_v50  ;;  %v1937_v50 = vpack.c.bf16 %v1454_v47, %v1453_v45 }
 0x9d9   :  { %v1407_v29 = vsel %vm79_vm0, %v1401_v46, 0.0 }
 0x9da   :  { %1408 = vadd.xlane.f32.xlu0 %v1407_v29  ;;  %v1404_v30 = vsel %vm79_vm0, %v1400_v41, 0.0  ;;  %1938 = vmatpush3.bf16.msra.mxu1 %v1937_v50 }
 0x9db   :  { %1405 = vadd.xlane.f32.xlu1 %v1404_v30  ;;  %1939 = vmatprep.subr.bf16.mxu1 %v2013_v49 }
 0xa67   :  { %v1409_v31 = vpop.xlane.xlu0 %1408 }
 0xa68   :  { %v1411_v32 = vmul.f32 0.03125, %v1409_v31  ;;  %v1406_v33 = vpop.xlane.xlu1 %1405 }
 0xa69   :  { %v1410_v34 = vmul.f32 0.03125, %v1406_v33 }
 0xa6a   :  { %v1413_v35 = vsub.f32 %v1401_v46, %v1411_v32 }
 0xa6b   :  { %v1412_v36 = vsub.f32 %v1400_v41, %v1410_v34 }
 0xa6c   :  { %v1415_v37 = vmul.f32 %v1413_v35, %v1413_v35 }
 0xa6d   :  { %v1414_v38 = vmul.f32 %v1412_v36, %v1412_v36 }
 0xa6e   :  { %v1419_v39 = vsel %vm79_vm0, %v1415_v37, 0.0 }
 0xa6f   :  { %1420 = vadd.xlane.f32.xlu0 %v1419_v39  ;;  %v1416_v40 = vsel %vm79_vm0, %v1414_v38, 0.0 }
 0xa70   :  { %1417 = vadd.xlane.f32.xlu1 %v1416_v40 }
 0xafc   :  { %v1421_v51 = vpop.xlane.xlu0 %1420 }
 0xafd   :  { %v1423_v52 = vmul.f32 0.03125, %v1421_v51  ;;  %v1418_v53 = vpop.xlane.xlu1 %1417 }
 0xafe   :  { %v1422_v54 = vmul.f32 0.03125, %v1418_v53 }
 0xaff   :  { %v1425_v55 = vadd.f32 1e-12, %v1423_v52 }
 0xb00   :  { %v1424_v56 = vadd.f32 1e-12, %v1422_v54 }
 0xb01   :  { %1979 = vrsqrt.f32 %v1425_v55 }
 0xb02   :  { %1981 = vrsqrt.f32 %v1424_v56 }
 0xb0b   :  { %v1980_v57 = vpop.eup %1979 }
 0xb0c   :  { %v1982_v59 = vpop.eup %1981  ;;  %v1429_v60 = vmul.f32 %v1980_v57, %v1413_v35 }
 0xb0d   :  { %v1428_v61 = vmul.f32 %v1982_v59, %v1412_v36 }
 0xb0e   :  { %v1437_v63 = vmul.f32 %v1669_v58, %v1429_v60 }
 0xb0f   :  { %v1436_v0 = vmul.f32 %v1669_v58, %v1428_v61 }
 0xb10   :  { %v1445_v1 = vadd.f32 %v1670_v62, %v1437_v63 }
 0xb11   :  { %v1444_v2 = vadd.f32 %v1670_v62, %v1436_v0 }
 0xb12   :  { %v1447_v3 = vrot.slane %v1445_v1, 7 }
 0xb14   :  { %v1450_v4 = vsel %vm1449_vm5, %v1444_v2, %v1447_v3 }
 0xb15   :  { %1864 = vmatmul.mubr.msk.f32.vlgmr.msra.gmra.mrb[14].mxu1 %vm79_vm0, %v1450_v4 }
 0xb16   :  { %1874 = vmatprep.mubr.msk.f32.mxu1 %vm2010_vm1, %v2009_v48  ;;  %1941 = vmatpush3.bf16.msra.mxu1 %v1940_v8  ;;  %v1671_v48 = vld [vmem:[%s2423_s20] ss:$0 sm:$0xff] }
 0xb17   :  { %1942 = vmatprep.subr.bf16.mxu1 %v2013_v49 }
 0xb1a   :  { %1944 = vmatpush3.bf16.msra.mxu1 %v1943_v10 }
 0xbe8   :  { %v1531_v11 = vpop.f32.mrb[14].mxu1 }
 0xbe9   :  { %v1532_v12 = vadd.f32 %v1671_v48, %v1531_v11  ;;  %v1865_v13 = vpop.f32.mrb[15].mxu1 }
 0xbeb   :  { %1983 = vtanh.f32 %v1532_v12 }
 0xbf5   :  { %v1984_v14 = vpop.eup %1983 }
 0xbf6   :  { %1875 = vmatmul.mubr.msk.f32.vlgmr.msra.gmra.mrb[16].mxu1 %vm79_vm0, %v1984_v14 }
 0xcc9   :  { %v1616_v16 = vpop.f32.mrb[16].mxu1 }
 0xcca   :  { %v1617_v17 = vadd.f32 %v1673_v15, %v1616_v16  ;;  %v1876_v18 = vpop.f32.mrb[17].mxu1 }
 0xccc   :  { %1620 = vst [vmem:[#allocation2] sm:$0x3] %v1617_v17 }
 0xccd   :  { %1996 = shalt.err (!%p1993_p4)
}
 0xcce   :  { %s1997_s16 = scalar_lea.hbm %s2426_s23, 32 }
 0xccf   :  { %p1998_p5 = scmp.ne.s32.totalorder %s2426_s23, %s1997_s16  ;;  %p2001_p6 = scmp.lt.u32.totalorder %s1997_s16, %s2426_s23 }
 0xcd1   :  { %p2003_p7 = pnand %p2001_p6, %p1998_p5 }
 0xcd3   :  { %2006 = shalt.err (!%p2003_p7)
}
 0xcd4   :  { %1630 = dma.vmem_to_hbm [thread:$0]  %s1628_s24, 32, %s2426_s23, [#allocation3]  }
 0xcd5   :  { %2007 = dma.done.wait [#allocation3], 32  }
 0xcd6   :  { %2008 = vsyncadd [#allocation3], 4294967264 }
 0xcd7   :  { %1634 = vsyncpa [#allocation3], 1 }

</bundles_post_ra>
